<compile_context>
chip_gen: v6e
topology: v6e:2x2x1
jax: 0.10.0
libtpu: 0.0.40
codegen_flags: <defaults>
</compile_context>

<pallas_src>
import functools

import jax
import jax.numpy as jnp
from jax import lax
from jax.experimental import pallas as pl
from jax.experimental.pallas import tpu as pltpu


def _ce_label_smooth_kernel(x_ref, t_ref, partial_ref, *,
                            epsilon, num_classes, n_total, tile_n):
    pid = pl.program_id(0)

    x = x_ref[...].astype(jnp.float32)           # (tile_n, C) logits, f32 in-kernel
    t = t_ref[...]                               # (tile_n, 1) int32 labels

    # Numerically stable logsumexp over the class (lane) axis; keep the shifted
    # logits around so they can be reused by the weighted reduction below.
    m = jnp.max(x, axis=-1, keepdims=True)                               # (tile_n, 1)
    xm = x - m                                                           # (tile_n, C)
    lse = m + jnp.log(jnp.sum(jnp.exp(xm), axis=-1, keepdims=True))      # (tile_n, 1)

    # Fused smoothed-target weights: w = (1-eps)*onehot + eps/C, sum_c w = 1.
    class_ids = lax.broadcasted_iota(jnp.int32, x.shape, 1)              # (tile_n, C)
    off = epsilon / num_classes
    w = jnp.where(class_ids == t, 1.0 - epsilon + off, off)
    # sum_c w*x = sum_c w*xm + m  (since sum_c w = 1)
    wx = jnp.sum(w * xm, axis=-1, keepdims=True) + m                     # (tile_n, 1)

    # loss_n = lse_n - sum_c w_{n,c} x_{n,c}
    per_row = lse - wx

    # Mask ragged tail rows (padded block rows must not contribute).
    row_ids = pid * tile_n + lax.broadcasted_iota(jnp.int32, per_row.shape, 0)
    per_row = jnp.where(row_ids < n_total, per_row, 0.0)

    # Per-tile partial sum; the wrapper sums across tiles and divides by N.
    partial_ref[0, 0] = jnp.sum(per_row)


def _vmem_capacity_bytes():
    try:
        return int(pltpu.get_tpu_info().vmem_capacity_bytes)
    except Exception:
        return 64 << 20  # conservative fallback (v7x per-TC VMEM)


def _pick_tile_n(n, c, itemsize, per_buffer_budget):
    # Lane-padding-aware per-row cost: logits row padded to a multiple of 128
    # lanes, plus the (., 1) int32 labels row padded to 128 lanes.
    c_padded = ((c + 127) // 128) * 128
    row_bytes = c_padded * itemsize + 128 * 4
    rows_by_vmem = max(16, per_buffer_budget // max(1, row_bytes))
    tile = min(n, rows_by_vmem)
    if tile < n:
        # second-to-last block dim: multiple of 16 (covers bf16 sublane packing)
        tile = max(16, (tile // 16) * 16)
    return int(tile)


def cross_entropy_label_smooth(inputs, targets, *, num_classes, epsilon,
                               tile_n=None):
    """inputs: (N, C) float logits (any float dtype); targets: (N,) int class ids."""
    n, c = inputs.shape
    assert c == num_classes
    t2d = targets.astype(jnp.int32).reshape(n, 1)

    itemsize = jnp.dtype(inputs.dtype).itemsize

    # Size tiles / VMEM limit based on the part's VMEM capacity.
    vmem_cap = _vmem_capacity_bytes()
    if vmem_cap >= (128 << 20):          # v5e / v6e: 128 MiB VMEM
        per_buffer_budget = 32 << 20
        limit_cap = 96 << 20
    else:                                # v7x: 64 MiB VMEM per TensorCore
        per_buffer_budget = 16 << 20
        limit_cap = 48 << 20

    if tile_n is None:
        tile_n = _pick_tile_n(n, c, itemsize, per_buffer_budget)
    tile_n = int(tile_n)
    num_tiles = int(pl.cdiv(n, tile_n))

    # Lane-padding-aware scoped-VMEM budget: double-buffered logits + labels.
    c_padded = ((c + 127) // 128) * 128
    logits_tile_bytes = tile_n * c_padded * itemsize
    labels_tile_bytes = tile_n * 128 * 4
    vmem_need = 2 * (logits_tile_bytes + labels_tile_bytes) + (2 << 20)
    vmem_limit = int(min(max(int(1.25 * vmem_need), 32 << 20), limit_cap))

    partials = pl.pallas_call(
        functools.partial(
            _ce_label_smooth_kernel,
            epsilon=float(epsilon),
            num_classes=int(num_classes),
            n_total=int(n),
            tile_n=tile_n,
        ),
        out_shape=jax.ShapeDtypeStruct((num_tiles, 1), jnp.float32),
        grid=(num_tiles,),
        in_specs=[
            pl.BlockSpec((tile_n, c), lambda i: (i, 0)),   # logits tile (native dtype)
            pl.BlockSpec((tile_n, 1), lambda i: (i, 0)),   # labels tile
        ],
        out_specs=pl.BlockSpec((1, 1), lambda i: (i, 0),
                               memory_space=pltpu.MemorySpace.SMEM),
        compiler_params=pltpu.CompilerParams(
            # Independent per-tile partials -> parallel (2-TC split on v7x).
            dimension_semantics=("parallel",),
            vmem_limit_bytes=vmem_limit,
        ),
    )(inputs, t2d)

    return jnp.sum(partials) / jnp.float32(n)


def _reference(inputs, targets, num_classes, epsilon):
    log_probs = jax.nn.log_softmax(inputs.astype(jnp.float32), axis=1)
    one_hot = jax.nn.one_hot(targets, num_classes, dtype=jnp.float32)
    smoothed = (1.0 - epsilon) * one_hot + epsilon / num_classes
    return (-smoothed * log_probs).mean(0).sum()


if __name__ == "__main__":
    num_classes = 32
    epsilon = 0.1

    key = jax.random.PRNGKey(0)
    k1, k2, k3, k4 = jax.random.split(key, 4)

    # Case 1: small batch, single block.
    batch = 8
    logits = jax.random.normal(k1, (batch, num_classes), dtype=jnp.float32)
    labels = jax.random.randint(k2, (batch,), 0, num_classes, dtype=jnp.int32)
    loss = cross_entropy_label_smooth(
        logits, labels, num_classes=num_classes, epsilon=epsilon)
    loss = jax.block_until_ready(loss)
    ref = _reference(logits, labels, num_classes, epsilon)
    assert jnp.allclose(loss, ref, atol=1e-5, rtol=1e-5), (loss, ref)

    # Case 2: forced small tile with a ragged tail (exercises multi-tile grid,
    # parallel per-tile partials, and the tail mask).
    batch2 = 20
    logits2 = jax.random.normal(k3, (batch2, num_classes), dtype=jnp.float32)
    labels2 = jax.random.randint(k4, (batch2,), 0, num_classes, dtype=jnp.int32)
    loss2 = cross_entropy_label_smooth(
        logits2, labels2, num_classes=num_classes, epsilon=epsilon, tile_n=16)
    loss2 = jax.block_until_ready(loss2)
    ref2 = _reference(logits2, labels2, num_classes, epsilon)
    assert jnp.allclose(loss2, ref2, atol=1e-5, rtol=1e-5), (loss2, ref2)

    # Case 3: bf16 logits streamed in native dtype (f32 math in-kernel).
    logits3 = logits2.astype(jnp.bfloat16)
    loss3 = cross_entropy_label_smooth(
        logits3, labels2, num_classes=num_classes, epsilon=epsilon, tile_n=16)
    loss3 = jax.block_until_ready(loss3)
    ref3 = _reference(logits3, labels2, num_classes, epsilon)
    assert jnp.allclose(loss3, ref3, atol=2e-2, rtol=2e-2), (loss3, ref3)

    print("KERNEL_OK")
</pallas_src>

<mosaic_0001>
module attributes {stable_mosaic.version = 11 : i64} {
  func.func @_ce_label_smooth_kernel(%arg0: i32, %arg1: memref<8x32xf32, #tpu.memory_space<vmem>>, %arg2: memref<8x1xi32, #tpu.memory_space<vmem>>, %arg3: memref<1x1xf32, #tpu.memory_space<smem>>) attributes {dimension_semantics = [#tpu.dimension_semantics<parallel>], iteration_bounds = array<i64: 1>, scalar_prefetch = 0 : i64, scratch_operands = 0 : i64, tpu.core_type = #tpu.core_type<tc>, window_params = [{transform_indices = @transform_0, window_bounds = array<i64: 8, 32>}, {transform_indices = @transform_1, window_bounds = array<i64: 8, 1>}, {transform_indices = @transform_2, window_bounds = array<i64: 1, 1>}]} {
    %c0 = arith.constant 0 : index
    %c0_0 = arith.constant 0 : index
    %0 = vector.load %arg1[%c0, %c0_0] : memref<8x32xf32, #tpu.memory_space<vmem>>, vector<8x32xf32>
    %c0_1 = arith.constant 0 : index
    %c0_2 = arith.constant 0 : index
    %1 = vector.load %arg2[%c0_1, %c0_2] : memref<8x1xi32, #tpu.memory_space<vmem>>, vector<8x1xi32>
    %cst = arith.constant dense<0xFF800000> : vector<8xf32>
    %2 = vector.multi_reduction <maximumf>, %0, %cst [1] : vector<8x32xf32> to vector<8xf32>
    %3 = vector.shape_cast %2 : vector<8xf32> to vector<8x1xf32>
    %4 = vector.broadcast %3 : vector<8x1xf32> to vector<8x32xf32>
    %5 = arith.subf %0, %4 : vector<8x32xf32>
    %6 = math.exp %5 : vector<8x32xf32>
    %cst_3 = arith.constant dense<0.000000e+00> : vector<8xf32>
    %7 = vector.multi_reduction <add>, %6, %cst_3 [1] : vector<8x32xf32> to vector<8xf32>
    %8 = vector.shape_cast %7 : vector<8xf32> to vector<8x1xf32>
    %9 = math.log %8 : vector<8x1xf32>
    %10 = arith.addf %3, %9 : vector<8x1xf32>
    %11 = tpu.iota {dimensions = array<i32: 1>} : vector<8x32xi32>
    %12 = vector.broadcast %1 : vector<8x1xi32> to vector<8x32xi32>
    %13 = arith.cmpi eq, %11, %12 : vector<8x32xi32>
    %cst_4 = arith.constant 0.903124988 : f32
    %cst_5 = arith.constant 3.125000e-03 : f32
    %14 = vector.broadcast %cst_4 : f32 to vector<8x32xf32>
    %15 = vector.broadcast %cst_5 : f32 to vector<8x32xf32>
    %16 = arith.select %13, %14, %15 : vector<8x32xi1>, vector<8x32xf32>
    %17 = arith.mulf %16, %5 : vector<8x32xf32>
    %cst_6 = arith.constant dense<0.000000e+00> : vector<8xf32>
    %18 = vector.multi_reduction <add>, %17, %cst_6 [1] : vector<8x32xf32> to vector<8xf32>
    %19 = vector.shape_cast %18 : vector<8xf32> to vector<8x1xf32>
    %20 = arith.addf %19, %3 : vector<8x1xf32>
    %21 = arith.subf %10, %20 : vector<8x1xf32>
    %c8_i32 = arith.constant 8 : i32
    %22 = arith.muli %arg0, %c8_i32 : i32
    %23 = tpu.iota {dimensions = array<i32: 0>} : vector<8x1xi32>
    %24 = vector.broadcast %22 : i32 to vector<8x1xi32>
    %25 = arith.addi %24, %23 : vector<8x1xi32>
    %c8_i32_7 = arith.constant 8 : i32
    %26 = vector.broadcast %c8_i32_7 : i32 to vector<8x1xi32>
    %27 = arith.cmpi slt, %25, %26 : vector<8x1xi32>
    %cst_8 = arith.constant 0.000000e+00 : f32
    %28 = vector.broadcast %cst_8 : f32 to vector<8x1xf32>
    %29 = arith.select %27, %21, %28 : vector<8x1xi1>, vector<8x1xf32>
    %30 = vector.shape_cast %29 : vector<8x1xf32> to vector<1x8x1xf32>
    %cst_9 = arith.constant dense<0.000000e+00> : vector<1xf32>
    %31 = vector.multi_reduction <add>, %30, %cst_9 [1, 2] : vector<1x8x1xf32> to vector<1xf32>
    %32 = vector.shape_cast %31 : vector<1xf32> to vector<1x1x1xf32>
    %33 = vector.extract %32[0, 0, 0] : f32 from vector<1x1x1xf32>
    %c0_10 = arith.constant 0 : index
    %c0_11 = arith.constant 0 : index
    %34 = memref.load %arg3[%c0_10, %c0_11] : memref<1x1xf32, #tpu.memory_space<smem>>
    memref.store %33, %arg3[%c0_10, %c0_11] : memref<1x1xf32, #tpu.memory_space<smem>>
    return
  }
  func.func @transform_0(%arg0: i32) -> (i32, i32) {
    %c0_i32 = arith.constant 0 : i32
    %c0_i32_0 = arith.constant 0 : i32
    return %arg0, %c0_i32 : i32, i32
  }
  func.func @transform_1(%arg0: i32) -> (i32, i32) {
    %c0_i32 = arith.constant 0 : i32
    %c0_i32_0 = arith.constant 0 : i32
    return %arg0, %c0_i32 : i32, i32
  }
  func.func @transform_2(%arg0: i32) -> (i32, i32) {
    %c0_i32 = arith.constant 0 : i32
    %c0_i32_0 = arith.constant 0 : i32
    return %arg0, %c0_i32 : i32, i32
  }
}

</mosaic_0001>

<bundles_post_ra>
// kernel: tpu_custom_call.1
= control target key start
LH: loop header
LB: loop body
LE: loop exit
PB: predicated region body
PF: predicated region fallthrough
CT: control target
= control target key end

     0   :  { %vm14_vm0 = vcmask 261120   ;;  %s123_s0 = inlined_call_operand.vmem [shape: f32[8,32], index: 0, kind: input, shape index: {}]   ;;  %s124_s1 = inlined_call_operand.vmem [shape: s32[8,1], index: 1, kind: input, shape index: {}]   ;;  %s125_s2 = inlined_call_operand.hbm [shape: f32[1,1], index: 2, kind: output, shape index: {}]  }
   0x1   :  { %v12_v0 = vld [vmem:[%s123_s0] sm:$0xff] }
   0x2   :  { %7 = vsyncpa [#allocation3], 0  ;;  %v15_v1 = vsel %vm14_vm0, %v12_v0, -inf  ;;  %v93_v2 = vmov 0   ;;  %v13_v3 = vld [vmem:[%s124_s1] sm:$0xff]  ;;  %v27_v7 = vlaneseq  ;;  %vm47_vm2 = vcmask 7168  }
   0x3   :  { %78 = vset.pattern.permute.xlu0 %v93_v2  ;;  %v94_v10 = vmov 0.003125   ;;  %s95_s1 = smov [#allocation2]  }
   0x4   :  { %16 = vmax.xlane.f32.xlu0 %v15_v1  ;;  %v28_v8 = vand.u32 127, %v27_v7 }
  0x1a   :  { %30 = vperm.xlu0 %78, %v13_v3  }
  0x8d   :  { %v17_v4 = vpop.xlane.xlu0 %16 }
  0x8e   :  { %v18_v5 = vsub.f32 %v12_v0, %v17_v4 }
  0x90   :  { %v19_v6 = vmul.f32 1.442695, %v18_v5 }
  0x92   :  { %79 = vpow2.f32 %v19_v6 }
  0x95   :  { %v31_v9 = vpop.permute.xlu0 %30 }
  0x96   :  { %vm32_vm1 = vcmp.eq.s32.totalorder %v28_v8, %v31_v9 }
  0x97   :  { %v33_v11 = vsel %vm32_vm1, 0.903125, %v94_v10 }
  0x98   :  { %v34_v14 = vmul.f32 %v33_v11, %v18_v5 }
  0x9a   :  { %v35_v15 = vsel %vm14_vm0, %v34_v14, 0.0 }
  0x9f   :  { %v80_v12 = vpop.eup %79 }
  0xa0   :  { %v21_v13 = vsel %vm14_vm0, %v80_v12, 0.0 }
  0xa1   :  { %22 = vadd.xlane.f32.xlu1 %v21_v13 }
  0xa5   :  { %36 = vadd.xlane.f32.xlu1 %v35_v15 }
 0x12a   :  { %v23_v16 = vpop.xlane.xlu1 %22 }
 0x12b   :  { %81 = vlog2.f32 %v23_v16 }
 0x12e   :  { %v37_v18 = vpop.xlane.xlu1 %36 }
 0x12f   :  { %v38_v20 = vadd.f32 %v37_v18, %v17_v4 }
 0x138   :  { %v82_v17 = vpop.eup %81 }
 0x139   :  { %v25_v19 = vmul.f32 0.6931472, %v82_v17 }
 0x13b   :  { %v26_v21 = vadd.f32 %v25_v19, %v17_v4 }
 0x13d   :  { %v39_v22 = vsub.f32 %v26_v21, %v38_v20 }
 0x13f   :  { %v48_v23 = vsel %vm47_vm2, %v39_v22, 0.0 }
 0x140   :  { %49 = vadd.xlane.f32.xlu1 %v48_v23 }
 0x1c9   :  { %v50_v24 = vpop.xlane.xlu1 %49 }
 0x1ca   :  { %v51_v25 = vrot.slane %v50_v24, 4 }
 0x1cc   :  { %v52_v26 = vadd.f32 %v51_v25, %v50_v24 }
 0x1ce   :  { %v53_v27 = vrot.slane %v52_v26, 2 }
 0x1d0   :  { %v54_v28 = vadd.f32 %v53_v27, %v52_v26 }
 0x1d2   :  { %v55_v29 = vrot.slane %v54_v28, 1 }
 0x1d4   :  { %v56_v30 = vadd.f32 %v55_v29, %v54_v28 }
 0x1d6   :  { %73 = vpush %v56_v30 }
 0x207   :  { %s74_s0 = spop %73 }
 0x208   :  { %59 = sst [smem:[#allocation2]] %s74_s0 }
 0x209   :  { %67 = dma.smem_to_hbm %s95_s1, 16, %s125_s2, [#allocation3]  }
 0x20a   :  { %91 = dma.done.wait [#allocation3], 16  }
 0x20b   :  { %92 = vsyncadd [#allocation3], 4294967280 }
 0x20c   :  { %71 = sfence }
 0x20d   :  { %72 = vsyncpa [#allocation3], 1 }

</bundles_post_ra>
